<compile_context>
chip_gen: v5e
topology: v5e:2x2
jax: 0.10.0
libtpu: 0.0.40
codegen_flags: <defaults>
</compile_context>

<pallas_src>
import math

import jax
import jax.numpy as jnp
from jax.experimental import pallas as pl
from jax.experimental.pallas import tpu as pltpu

_PALLAS_MIN_BYTES = 2 << 20   # below this, fused XLA subtract wins


def _diff_kernel(a_ref, b_ref, o_ref):
    # Elementwise subtraction on the current VMEM tile (pure VPU op).
    o_ref[...] = a_ref[...] - b_ref[...]


def _tpu_params():
    """(per-core VMEM capacity bytes, TensorCore count); conservative fallback."""
    vmem_cap = 64 << 20   # v7x per-TC capacity = safest default
    num_cores = 1
    try:
        info = pltpu.get_tpu_info()
        cap = int(info.vmem_capacity_bytes)
        if cap >= (16 << 20):
            vmem_cap = cap
        for attr in ("num_cores", "core_count", "num_tensorcores", "tensorcore_count"):
            v = getattr(info, attr, None)
            if v:
                num_cores = int(v)
                break
    except Exception:
        pass
    return vmem_cap, max(1, num_cores)


def _choose_cols(total):
    """Pick a lane-dense column width. Returns (cols, pad_elements)."""
    for c in (512, 256, 128):
        if total % c == 0:
            return c, 0
    # No clean 128-multiple split: fall back to cols=128 with minimal padding.
    cols = 128
    rows = -(-total // cols)
    return cols, rows * cols - total


def _choose_tile_rows(rows, cols, itemsize, align, vmem_cap, num_cores):
    """Row-tile size: VMEM-budgeted, dtype-aligned, core-count-aware."""
    if rows <= align:
        return rows  # single full-extent block along the row axis
    # 3 refs x 2 pipeline buffers, kept under ~1/4 of VMEM for headroom.
    per_buffer = (vmem_cap // 4) // 6
    tile = max(align, (per_buffer // (cols * itemsize)) // align * align)
    if num_cores > 1:
        # >= ~4 grid steps per TensorCore so each core keeps its pipeline full.
        desired_steps = 4 * num_cores
        per_step = -(-rows // desired_steps)
        per_step = max(align, -(-per_step // align) * align)
        tile = min(tile, per_step)
    # Never exceed the row count (floor to alignment keeps the block legal;
    # the final grid step covers any ragged remainder as a partial tile).
    tile = min(tile, max(align, (rows // align) * align))
    return tile


def _diff_pallas(input0: jax.Array, input1: jax.Array) -> jax.Array:
    """Always-Pallas path (caller guarantees total > 0)."""
    orig_shape = input0.shape
    total = int(math.prod(orig_shape))
    dtype = input0.dtype
    itemsize = jnp.dtype(dtype).itemsize
    align = max(8, 32 // itemsize)   # sublane packing: 8 f32, 16 bf16/f16, 32 int8/fp8

    cols, pad = _choose_cols(total)
    rows = (total + pad) // cols

    flat0 = input0.reshape(-1)
    flat1 = input1.reshape(-1)
    if pad:
        flat0 = jnp.pad(flat0, (0, pad))
        flat1 = jnp.pad(flat1, (0, pad))
    a2 = flat0.reshape(rows, cols)
    b2 = flat1.reshape(rows, cols)

    vmem_cap, num_cores = _tpu_params()
    tile_rows = _choose_tile_rows(rows, cols, itemsize, align, vmem_cap, num_cores)
    grid_steps = -(-rows // tile_rows)

    footprint = 6 * tile_rows * cols * itemsize           # 3 refs x 2 buffers
    vmem_limit = int(min(vmem_cap // 2, max(footprint + (8 << 20), 16 << 20)))
    cost = pl.CostEstimate(
        flops=total,
        transcendentals=0,
        bytes_accessed=3 * total * itemsize,
    )

    out2 = pl.pallas_call(
        _diff_kernel,
        out_shape=jax.ShapeDtypeStruct((rows, cols), dtype),
        grid_spec=pltpu.PrefetchScalarGridSpec(
            num_scalar_prefetch=0,
            grid=(grid_steps,),
            in_specs=[
                pl.BlockSpec((tile_rows, cols), lambda i: (i, 0)),
                pl.BlockSpec((tile_rows, cols), lambda i: (i, 0)),
            ],
            out_specs=pl.BlockSpec((tile_rows, cols), lambda i: (i, 0)),
        ),
        compiler_params=pltpu.CompilerParams(
            dimension_semantics=("parallel",),
            vmem_limit_bytes=vmem_limit,
        ),
        cost_estimate=cost,
    )(a2, b2)

    out_flat = out2.reshape(-1)
    if pad:
        out_flat = out_flat[:total]
    return out_flat.reshape(orig_shape)


def diff(input0: jax.Array, input1: jax.Array) -> jax.Array:
    """Pallas equivalent of DiffModule.forward: INPUT0 - INPUT1."""
    assert input0.shape == input1.shape, "DiffModule requires same-shaped inputs"
    assert input0.dtype == input1.dtype
    total = int(math.prod(input0.shape))
    itemsize = jnp.dtype(input0.dtype).itemsize
    if total == 0 or total * itemsize < _PALLAS_MIN_BYTES:
        # Launch + per-step overhead dominates tiny inputs: let XLA fuse it.
        return input0 - input1
    return _diff_pallas(input0, input1)


if __name__ == "__main__":
    # DiffModule has no parameters; only two same-shaped inputs are required.
    key = jax.random.PRNGKey(0)
    k0, k1 = jax.random.split(key)

    # Small NCHW-like shape consistent with the module.
    shape = (2, 4, 16, 16)
    input0 = jax.random.normal(k0, shape, dtype=jnp.float32)
    input1 = jax.random.normal(k1, shape, dtype=jnp.float32)
    ref = input0 - input1

    # 1) Pallas kernel exercised directly on the demo shape (zero-copy slab,
    #    cols=512, rows=4, single full-extent block).
    out = jax.block_until_ready(_diff_pallas(input0, input1))
    assert out.shape == ref.shape and out.dtype == ref.dtype
    assert jnp.allclose(out, ref), "mismatch vs reference subtraction (small)"

    # 2) Public dispatcher (small arrays take the fused-XLA fast path).
    out_d = jax.block_until_ready(diff(input0, input1))
    assert jnp.allclose(out_d, ref), "dispatcher mismatch"

    # 3) Medium shape: multi-step grid with a partial (masked) last row-tile.
    shape_m = (3, 5, 16, 128)        # total = 30720 -> (60, 512) slab
    a = jax.random.normal(k0, shape_m, dtype=jnp.float32)
    b = jax.random.normal(k1, shape_m, dtype=jnp.float32)
    out_m = jax.block_until_ready(_diff_pallas(a, b))
    assert jnp.allclose(out_m, a - b), "mismatch vs reference subtraction (medium)"

    # 4) Ragged total (no 128-multiple split): exercises the padded fallback.
    shape_r = (10, 100)              # total = 1000 -> pad 24 -> (8, 128) slab
    ar = jax.random.normal(k0, shape_r, dtype=jnp.float32)
    br = jax.random.normal(k1, shape_r, dtype=jnp.float32)
    out_r = jax.block_until_ready(_diff_pallas(ar, br))
    assert jnp.allclose(out_r, ar - br), "mismatch vs reference subtraction (ragged)"

    print("KERNEL_OK")
</pallas_src>

<mosaic_0001>
module attributes {stable_mosaic.version = 11 : i64} {
  func.func @_diff_kernel(%arg0: i32, %arg1: memref<4x512xf32, #tpu.memory_space<vmem>>, %arg2: memref<4x512xf32, #tpu.memory_space<vmem>>, %arg3: memref<4x512xf32, #tpu.memory_space<vmem>>) attributes {dimension_semantics = [#tpu.dimension_semantics<parallel>], iteration_bounds = array<i64: 1>, scalar_prefetch = 0 : i64, scratch_operands = 0 : i64, tpu.core_type = #tpu.core_type<tc>, window_params = [{transform_indices = @transform_0, window_bounds = array<i64: 4, 512>}, {transform_indices = @transform_1, window_bounds = array<i64: 4, 512>}, {transform_indices = @transform_2, window_bounds = array<i64: 4, 512>}]} {
    %c0 = arith.constant 0 : index
    %c0_0 = arith.constant 0 : index
    %0 = vector.load %arg1[%c0, %c0_0] : memref<4x512xf32, #tpu.memory_space<vmem>>, vector<4x512xf32>
    %c0_1 = arith.constant 0 : index
    %c0_2 = arith.constant 0 : index
    %1 = vector.load %arg2[%c0_1, %c0_2] : memref<4x512xf32, #tpu.memory_space<vmem>>, vector<4x512xf32>
    %2 = arith.subf %0, %1 : vector<4x512xf32>
    %c0_3 = arith.constant 0 : index
    %c0_4 = arith.constant 0 : index
    %3 = vector.load %arg3[%c0_3, %c0_4] : memref<4x512xf32, #tpu.memory_space<vmem>>, vector<4x512xf32>
    tpu.vector_store %arg3[%c0_3, %c0_4], %2 {strides = array<i32>} : memref<4x512xf32, #tpu.memory_space<vmem>>, vector<4x512xf32>,
    return
  }
  func.func @transform_0(%arg0: i32) -> (i32, i32) {
    %c0_i32 = arith.constant 0 : i32
    %c0_i32_0 = arith.constant 0 : i32
    return %arg0, %c0_i32 : i32, i32
  }
  func.func @transform_1(%arg0: i32) -> (i32, i32) {
    %c0_i32 = arith.constant 0 : i32
    %c0_i32_0 = arith.constant 0 : i32
    return %arg0, %c0_i32 : i32, i32
  }
  func.func @transform_2(%arg0: i32) -> (i32, i32) {
    %c0_i32 = arith.constant 0 : i32
    %c0_i32_0 = arith.constant 0 : i32
    return %arg0, %c0_i32 : i32, i32
  }
}

</mosaic_0001>

<bundles_post_ra>
// kernel: tpu_custom_call.1
= control target key start
LH: loop header
LB: loop body
LE: loop exit
PB: predicated region body
PF: predicated region fallthrough
CT: control target
= control target key end

     0   :  { %7 = vsyncpa [#allocation3], 0  ;;  %s174_s0 = inlined_call_operand.hbm [shape: f32[4,512], index: 0, kind: input, shape index: {}]   ;;  %s175_s1 = inlined_call_operand.hbm [shape: f32[4,512], index: 1, kind: input, shape index: {}]   ;;  %s176_s2 = inlined_call_operand.hbm [shape: f32[4,512], index: 2, kind: output, shape index: {}]  }
   0x1   :  { %8 = vsyncpa [#allocation6], 0 }
   0x2   :  { %9 = vsyncpa [#allocation4], 0  ;;  %s15_s11 = sshll.u32 %s174_s0, 4  ;;  %s147_s12 = smov [#allocation2]   ;;  %s16_s11 = int_to_ptr.hbm [resolvable:$true] %s15_s11 }
   0x3   :  { %s17_s13 = sshll.u32 %s147_s12, 4  ;;  %s26_s16 = sshll.u32 %s175_s1, 4  ;;  %s18_s13 = int_to_ptr.vmem [resolvable:$true] %s17_s13  ;;  %s27_s16 = int_to_ptr.hbm [resolvable:$true] %s26_s16 }
   0x4   :  { %20 = dma.hbm_to_vmem [thread:$0]  %s16_s11, 256, %s18_s13, [#allocation3]  }
   0x5   :  { %s148_s17 = smov [#allocation5]  }
   0x6   :  { %s28_s18 = sshll.u32 %s148_s17, 4  ;;  %s29_s18 = int_to_ptr.vmem [resolvable:$true] %s28_s18 }
   0x7   :  { %31 = dma.hbm_to_vmem [thread:$0]  %s27_s16, 256, %s29_s18, [#allocation6]  }
   0x8   :  { %141 = dma.done.wait [#allocation3], 256  }
   0x9   :  { %142 = vsyncadd [#allocation3], 4294967040 }
   0xa   :  { %143 = dma.done.wait [#allocation6], 256  }
   0xb   :  { %144 = vsyncadd [#allocation6], 4294967040  ;;  %s149_s19 = smov [#allocation7]   ;;  %s55_s22 = sshll.u32 %s176_s2, 4  ;;  %v40_v0 = vld [vmem:[#allocation2] sm:$0xff]  ;;  %v42_v1 = vld [vmem:[#allocation5] sm:$0xff]  ;;  %s56_s22 = int_to_ptr.hbm [resolvable:$true] %s55_s22 }
   0xc   :  { %s53_s0 = sshll.u32 %s149_s19, 4  ;;  %v41_v2 = vld [vmem:[#allocation2 + $0x8] sm:$0xff]  ;;  %v44_v3 = vsub.f32 %v40_v0, %v42_v1  ;;  %v43_v4 = vld [vmem:[#allocation5 + $0x8] sm:$0xff]  ;;  %s54_s0 = int_to_ptr.vmem [resolvable:$true] %s53_s0 }
   0xd   :  { %v45_v5 = vsub.f32 %v41_v2, %v43_v4 }
   0xe   :  { %46 = vst [vmem:[#allocation7] sm:$0xff] %v44_v3 }
   0xf   :  { %47 = vst [vmem:[#allocation7 + $0x8] sm:$0xff] %v45_v5 }
  0x10   :  { %58 = dma.vmem_to_hbm [thread:$0]  %s54_s0, 256, %s56_s22, [#allocation4]  }
  0x11   :  { %145 = dma.done.wait [#allocation4], 256  }
  0x12   :  { %146 = vsyncadd [#allocation4], 4294967040 }
  0x13   :  { %63 = vsyncpa [#allocation3], 1 }
  0x14   :  { %64 = vsyncpa [#allocation6], 1 }
  0x15   :  { %65 = vsyncpa [#allocation4], 1 }

</bundles_post_ra>
